<compile_context>
chip_gen: v5e
topology: v5e:2x2
jax: 0.10.0
libtpu: 0.0.40
codegen_flags: <defaults>
</compile_context>

<pallas_src>
from functools import partial
from typing import Tuple

import numpy as np
import jax
import jax.numpy as jnp
from jax import lax
from jax.experimental import pallas as pl
from jax.experimental.pallas import tpu as pltpu


def _compute_zero_padding(kernel_size: Tuple[int, int]) -> Tuple[int, int]:
    return ((kernel_size[0] - 1) // 2, (kernel_size[1] - 1) // 2)


def _med3(a, b, c):
    """Elementwise median of three (4 min/max ops)."""
    mn = jnp.minimum(a, b)
    mx = jnp.maximum(a, b)
    return jnp.maximum(mn, jnp.minimum(mx, c))


def _sort3(a, b, c):
    """Elementwise (min, med, max) of three (6 min/max ops with sharing)."""
    mn_ab = jnp.minimum(a, b)
    mx_ab = jnp.maximum(a, b)
    lo = jnp.minimum(mn_ab, c)
    hi = jnp.maximum(mx_ab, c)
    me = jnp.maximum(mn_ab, jnp.minimum(mx_ab, c))
    return lo, me, hi


def _select_rank(vals, m):
    """Elementwise value of rank `m` (0-indexed) among the arrays in `vals`.

    Odd-even transposition network pruned by backward liveness to only the
    compare-exchanges that can influence output position m ("forgetful"
    selection) -- provably the same result as a full sort (dead ops removed).
    NOTE: NaN propagation differs from torch's sort-based median for float
    inputs containing NaN.
    """
    k = len(vals)
    if k == 1:
        return vals[0]

    passes = [[(i, i + 1) for i in range(p % 2, k - 1, 2)] for p in range(k)]
    needed = {m}
    plan = []
    for ce_list in reversed(passes):
        cur = []
        for (i, j) in ce_list:
            ni, nj = i in needed, j in needed
            if not (ni or nj):
                continue
            cur.append((i, j, ni, nj))
            needed.add(i)
            needed.add(j)
        plan.append(cur)
    plan.reverse()

    v = list(vals)
    for cur in plan:
        for (i, j, ni, nj) in cur:
            a, b = v[i], v[j]
            if ni:
                v[i] = jnp.minimum(a, b)
            if nj:
                v[j] = jnp.maximum(a, b)
    return v[m]


def _median_blur_kernel(col_ref, x_ref, o_ref, xp_ref, *cs_refs,
                        W, kh, kw, ph, pw, pad_left, chunk, lane_chunk):
    # col_ref: (1, L) int32 column index (w) of every flattened lane.
    # x_ref:   (G, L) block of flattened images, L == H*W (lane-dense).
    # o_ref:   (G, L) output block, same layout.
    # xp_ref:  (G, pad_left + L + pad_right) VMEM scratch (flat halo padding).
    # cs_refs: (3x3 only) three (chunk, lane_chunk + 2) scratches holding the
    #          per-column sorted triple (lo, me, hi) of the current chunk.
    G, L = x_ref.shape
    dtype = x_ref.dtype
    l_pad = xp_ref.shape[1]
    pad_right = l_pad - pad_left - L

    CL = lane_chunk
    n_row_chunks = G // chunk
    n_lane_chunks = L // CL
    lane_unroll = True if n_lane_chunks <= 8 else 4
    use_33 = (kh == 3 and kw == 3)
    rank = (kh * kw - 1) // 2          # torch.median -> lower median

    def hint(v, m):
        return v if isinstance(v, int) else pl.multiple_of(v, m)

    def fill_chunk(r, i_c, carry):
        # Copy one (chunk, CL) tile of the input into the padded scratch.
        q = hint(i_c * CL, CL)
        xp_ref[pl.ds(r, chunk), pl.ds(pad_left + q, CL)] = \
            x_ref[pl.ds(r, chunk), pl.ds(q, CL)]
        return carry

    def compute_chunk(r, i_c, carry):
        q = hint(i_c * CL, CL)
        rows = pl.ds(r, chunk)
        col = col_ref[:, pl.ds(q, CL)]                       # (1, CL) int32
        zero = jnp.zeros((chunk, CL), dtype)

        if use_33:
            lo_ref, me_ref, hi_ref = cs_refs
            # Vertical triple over a CL+2 span so w-1 / w / w+1 are plain
            # static slices of the stored column statistics.
            span = CL + 2
            base = pad_left + q - 1
            up = xp_ref[rows, pl.ds(base - W, span)]
            md = xp_ref[rows, pl.ds(base, span)]
            dn = xp_ref[rows, pl.ds(base + W, span)]
            lo, me, hi = _sort3(up, md, dn)
            lo_ref[...] = lo
            me_ref[...] = me
            hi_ref[...] = hi

            # W-direction zero-padding masks, one compare each at (1, CL),
            # broadcast once per chunk (JAX does not CSE broadcast_in_dim).
            left_ok = jnp.broadcast_to(col >= 1, (chunk, CL))
            right_ok = jnp.broadcast_to(col <= W - 2, (chunk, CL))

            lo_l = jnp.where(left_ok, lo_ref[:, 0:CL], zero)
            me_l = jnp.where(left_ok, me_ref[:, 0:CL], zero)
            hi_l = jnp.where(left_ok, hi_ref[:, 0:CL], zero)
            lo_c = lo_ref[:, 1:CL + 1]
            me_c = me_ref[:, 1:CL + 1]
            hi_c = hi_ref[:, 1:CL + 1]
            lo_r = jnp.where(right_ok, lo_ref[:, 2:CL + 2], zero)
            me_r = jnp.where(right_ok, me_ref[:, 2:CL + 2], zero)
            hi_r = jnp.where(right_ok, hi_ref[:, 2:CL + 2], zero)

            a = jnp.maximum(jnp.maximum(lo_l, lo_c), lo_r)
            b = _med3(me_l, me_c, me_r)
            c = jnp.minimum(jnp.minimum(hi_l, hi_c), hi_r)
            out = _med3(a, b, c)
        else:
            # General k: pruned odd-even selection over the kh*kw taps.
            masks = {}
            for dj in range(kw):
                off = dj - pw
                if off < 0:
                    masks[dj] = jnp.broadcast_to(col >= -off, (chunk, CL))
                elif off > 0:
                    masks[dj] = jnp.broadcast_to(col < (W - off), (chunk, CL))
            taps = []
            for di in range(kh):
                for dj in range(kw):
                    s = pad_left + q + (di - ph) * W + (dj - pw)
                    t = xp_ref[rows, pl.ds(s, CL)]
                    if dj in masks:
                        t = jnp.where(masks[dj], t, zero)
                    taps.append(t)
            out = _select_rank(taps, rank)

        o_ref[rows, pl.ds(q, CL)] = out
        return carry

    def row_body(i_r, carry):
        r = hint(i_r * chunk, chunk)
        # Zero halos for this row group (realizes the H-direction zero pad;
        # rewritten every step so megacore grid splitting stays correct).
        if pad_left > 0:
            xp_ref[pl.ds(r, chunk), pl.ds(0, pad_left)] = \
                jnp.zeros((chunk, pad_left), dtype)
        if pad_right > 0:
            xp_ref[pl.ds(r, chunk), pl.ds(pad_left + L, pad_right)] = \
                jnp.zeros((chunk, pad_right), dtype)
        if n_lane_chunks == 1:
            fill_chunk(r, 0, 0)
            compute_chunk(r, 0, 0)
        else:
            lax.fori_loop(0, n_lane_chunks, partial(fill_chunk, r), 0,
                          unroll=lane_unroll)
            lax.fori_loop(0, n_lane_chunks, partial(compute_chunk, r), 0,
                          unroll=lane_unroll)
        return carry

    if n_row_chunks == 1:
        row_body(0, 0)
    else:
        lax.fori_loop(0, n_row_chunks, row_body, 0,
                      unroll=True if n_row_chunks <= 8 else 4)


def median_blur(x: jnp.ndarray, kernel_size: Tuple[int, int]) -> jnp.ndarray:
    """Median blur matching kornia.filters.median_blur semantics (zero pad,
    lower median), for NCHW inputs."""
    if x.ndim != 4:
        raise ValueError(f"Invalid input shape, we expect BxCxHxW. Got: {x.shape}")
    kh, kw = int(kernel_size[0]), int(kernel_size[1])
    ph, pw = _compute_zero_padding((kh, kw))

    B, C, H, W = x.shape
    H_out = H + 2 * ph - kh + 1
    W_out = W + 2 * pw - kw + 1
    N = B * C
    L = H * W
    k = kh * kw
    dtype = x.dtype
    itemsize = jnp.dtype(dtype).itemsize
    use_33 = (kh == 3 and kw == 3)

    # Free (contiguous) reshape: (B, C, H, W) -> (N, H*W); the tensor crosses
    # HBM exactly once on each side.
    x_flat = x.reshape(N, L)

    # Flat halo sizes; the left halo is aligned to 128 lanes so the main tile
    # copy into the padded scratch is a lane-aligned (unmasked) store.
    pad_left = ph * W + pw
    if pad_left > 0:
        pad_left = ((pad_left + 127) // 128) * 128
    pad_right = (kh - 1 - ph) * W + (kw - 1 - pw)
    l_pad = pad_left + L + pad_right

    # Row-group ("chunk") size: the sublane packing granularity of the dtype.
    sub_mult = {4: 8, 2: 16, 1: 32}.get(itemsize, 8)

    # ---- images per grid step -------------------------------------------
    # Budget with 4-byte elements: v5e's VPU has no narrow-dtype path, so
    # bf16/int8 temporaries get widened to 32-bit inside the compute.
    elem = 4 if itemsize < 4 else itemsize
    per_row = (4 * L + l_pad) * elem + 2048   # 2x in + 2x out (dbl buf) + xp + slack
    try:
        vmem_cap = int(pltpu.get_tpu_info().vmem_capacity_bytes)
    except Exception:
        vmem_cap = 64 * 1024 * 1024
    budget = min(24 * 1024 * 1024, vmem_cap // 3)

    if N <= sub_mult:
        g = N
    else:
        g = min(N, max(1, budget // per_row))
        g = (g // sub_mult) * sub_mult            # round DOWN: stay inside budget
        if N >= 2 * sub_mult:
            # Keep the (parallel) grid at >= 2 steps so v7x's two TensorCores
            # both get work.
            half = (((N + 1) // 2 + sub_mult - 1) // sub_mult) * sub_mult
            g = min(g, half)
        g = max(sub_mult, g)
        # TODO(synk): if even `sub_mult` rows exceed the budget (multi-MB
        # single images), switch to 2-D spatial tiling of each image
        # (H-blocks with halo rows) instead of whole-image lane rows.
    chunk = min(sub_mult, g)

    # ---- lane chunk: keep per-chunk tap temporaries inside ~48 vregs ------
    n_live = 16 if use_33 else (k + 10)
    cl_cap = max(128, ((48 * 1024) // (n_live * chunk)) // 128 * 128)
    if L % 128 == 0 and L > cl_cap:
        CL = cl_cap
        while L % CL:
            CL -= 128
    else:
        CL = L

    # Raise the scoped VMEM limit to match the chosen working set.
    need = g * (4 * L + l_pad) * itemsize + 3 * chunk * (CL + 2) * elem + (4 << 20)
    vmem_limit = int(min(max(need, 32 * 1024 * 1024), vmem_cap * 9 // 10))

    # Column index of every flattened lane (tiny constant input; one vector
    # compare per mask inside the kernel).
    col_idx = jnp.asarray(np.tile(np.arange(W, dtype=np.int32), H)[None, :])

    kernel = partial(_median_blur_kernel, W=W, kh=kh, kw=kw, ph=ph, pw=pw,
                     pad_left=pad_left, chunk=chunk, lane_chunk=CL)

    scratch_shapes = [pltpu.VMEM((g, l_pad), dtype)]
    if use_33:
        scratch_shapes += [pltpu.VMEM((chunk, CL + 2), dtype)] * 3

    out_flat = pl.pallas_call(
        kernel,
        out_shape=jax.ShapeDtypeStruct((N, L), dtype),
        grid_spec=pltpu.PrefetchScalarGridSpec(
            num_scalar_prefetch=0,
            grid=(pl.cdiv(N, g),),
            in_specs=[
                pl.BlockSpec((1, L), lambda i: (0, 0)),
                pl.BlockSpec((g, L), lambda i: (i, 0)),
            ],
            out_specs=pl.BlockSpec((g, L), lambda i: (i, 0)),
            scratch_shapes=scratch_shapes,
        ),
        compiler_params=pltpu.CompilerParams(
            dimension_semantics=("parallel",),
            vmem_limit_bytes=vmem_limit,
        ),
    )(col_idx, x_flat)

    out = out_flat.reshape(B, C, H, W)
    if (H_out, W_out) != (H, W):   # only differs for even kernel sizes
        # TODO(synk): for even kernels, write only the valid region from
        # inside the kernel instead of this extra XLA crop pass.
        out = out[:, :, :H_out, :W_out]
    return out


class MedianBlur:
    """Pallas counterpart of kornia MedianBlur.  No learned parameters."""

    def __init__(self, kernel_size: Tuple[int, int]) -> None:
        self.kernel_size = kernel_size

    def __call__(self, x: jnp.ndarray) -> jnp.ndarray:
        return median_blur(x, self.kernel_size)


def _reference_median_blur(x: jnp.ndarray, kernel_size: Tuple[int, int]) -> jnp.ndarray:
    """Pure-JAX reference reproducing the PyTorch semantics (lower median)."""
    kh, kw = kernel_size
    ph, pw = _compute_zero_padding((kh, kw))
    B, C, H, W = x.shape
    H_out = H + 2 * ph - kh + 1
    W_out = W + 2 * pw - kw + 1
    xp = jnp.pad(x, ((0, 0), (0, 0), (ph, ph), (pw, pw)))
    feats = jnp.stack(
        [xp[:, :, di:di + H_out, dj:dj + W_out] for di in range(kh) for dj in range(kw)],
        axis=2,
    )
    k = kh * kw
    m = (k - 1) // 2
    return jnp.sort(feats, axis=2)[:, :, m]


if __name__ == "__main__":
    key = jax.random.PRNGKey(0)

    # Main check: 3x3 median blur on (2, 4, 16, 16) (shared-column-sort path).
    x = jax.random.uniform(key, (2, 4, 16, 16), dtype=jnp.float32)
    blur = MedianBlur((3, 3))
    y = jax.block_until_ready(blur(x))
    y_ref = _reference_median_blur(x, (3, 3))
    assert y.shape == (2, 4, 16, 16), y.shape
    assert jnp.allclose(y, y_ref, atol=1e-6), "3x3 mismatch vs reference"

    # Secondary check: exercises the generic pruned selection network and a
    # lane width that is not a multiple of 128.
    x2 = jax.random.uniform(jax.random.PRNGKey(1), (1, 2, 12, 20), dtype=jnp.float32)
    y2 = jax.block_until_ready(median_blur(x2, (5, 3)))
    y2_ref = _reference_median_blur(x2, (5, 3))
    assert y2.shape == (1, 2, 12, 20), y2.shape
    assert jnp.allclose(y2, y2_ref, atol=1e-6), "5x3 mismatch vs reference"

    print("KERNEL_OK")
</pallas_src>

<mosaic_0001>
module attributes {stable_mosaic.version = 11 : i64} {
  func.func @_median_blur_kernel(%arg0: i32, %arg1: memref<1x256xi32, #tpu.memory_space<vmem>>, %arg2: memref<8x256xf32, #tpu.memory_space<vmem>>, %arg3: memref<8x256xf32, #tpu.memory_space<vmem>>, %arg4: memref<8x401xf32, #tpu.memory_space<vmem>>, %arg5: memref<8x258xf32, #tpu.memory_space<vmem>>, %arg6: memref<8x258xf32, #tpu.memory_space<vmem>>, %arg7: memref<8x258xf32, #tpu.memory_space<vmem>>) attributes {dimension_semantics = [#tpu.dimension_semantics<parallel>], iteration_bounds = array<i64: 1>, scalar_prefetch = 0 : i64, scratch_operands = 4 : i64, tpu.core_type = #tpu.core_type<tc>, window_params = [{pipeline_mode = #tpu.pipeline_mode<synchronous>, transform_indices = @transform_0, window_bounds = array<i64: 1, 256>}, {transform_indices = @transform_1, window_bounds = array<i64: 8, 256>}, {transform_indices = @transform_2, window_bounds = array<i64: 8, 256>}]} {
    %cst = arith.constant 0.000000e+00 : f32
    %0 = vector.broadcast %cst : f32 to vector<8x128xf32>
    %c0 = arith.constant 0 : index
    %c0_0 = arith.constant 0 : index
    %1 = vector.load %arg4[%c0, %c0_0] : memref<8x401xf32, #tpu.memory_space<vmem>>, vector<8x128xf32>
    tpu.vector_store %arg4[%c0, %c0_0], %0 {strides = array<i32>} : memref<8x401xf32, #tpu.memory_space<vmem>>, vector<8x128xf32>,
    %cst_1 = arith.constant 0.000000e+00 : f32
    %2 = vector.broadcast %cst_1 : f32 to vector<8x17xf32>
    %c0_2 = arith.constant 0 : index
    %c384 = arith.constant 384 : index
    %3 = vector.load %arg4[%c0_2, %c384] : memref<8x401xf32, #tpu.memory_space<vmem>>, vector<8x17xf32>
    tpu.vector_store %arg4[%c0_2, %c384], %2 {strides = array<i32>} : memref<8x401xf32, #tpu.memory_space<vmem>>, vector<8x17xf32>,
    %c0_3 = arith.constant 0 : index
    %c0_4 = arith.constant 0 : index
    %4 = vector.load %arg2[%c0_3, %c0_4] : memref<8x256xf32, #tpu.memory_space<vmem>>, vector<8x256xf32>
    %c0_5 = arith.constant 0 : index
    %c128 = arith.constant 128 : index
    %5 = vector.load %arg4[%c0_5, %c128] : memref<8x401xf32, #tpu.memory_space<vmem>>, vector<8x256xf32>
    tpu.vector_store %arg4[%c0_5, %c128], %4 {strides = array<i32>} : memref<8x401xf32, #tpu.memory_space<vmem>>, vector<8x256xf32>,
    %c0_6 = arith.constant 0 : index
    %c0_7 = arith.constant 0 : index
    %6 = vector.load %arg1[%c0_6, %c0_7] : memref<1x256xi32, #tpu.memory_space<vmem>>, vector<1x256xi32>
    %cst_8 = arith.constant 0.000000e+00 : f32
    %7 = vector.broadcast %cst_8 : f32 to vector<8x256xf32>
    %c0_9 = arith.constant 0 : index
    %c111 = arith.constant 111 : index
    %8 = vector.load %arg4[%c0_9, %c111] : memref<8x401xf32, #tpu.memory_space<vmem>>, vector<8x258xf32>
    %c0_10 = arith.constant 0 : index
    %c127 = arith.constant 127 : index
    %9 = vector.load %arg4[%c0_10, %c127] : memref<8x401xf32, #tpu.memory_space<vmem>>, vector<8x258xf32>
    %c0_11 = arith.constant 0 : index
    %c143 = arith.constant 143 : index
    %10 = vector.load %arg4[%c0_11, %c143] : memref<8x401xf32, #tpu.memory_space<vmem>>, vector<8x258xf32>
    %11 = arith.minimumf %8, %9 : vector<8x258xf32>
    %12 = arith.maximumf %8, %9 : vector<8x258xf32>
    %13 = arith.minimumf %11, %10 : vector<8x258xf32>
    %14 = arith.maximumf %12, %10 : vector<8x258xf32>
    %15 = arith.minimumf %12, %10 : vector<8x258xf32>
    %16 = arith.maximumf %11, %15 : vector<8x258xf32>
    %c0_12 = arith.constant 0 : index
    %c0_13 = arith.constant 0 : index
    %17 = vector.load %arg5[%c0_12, %c0_13] : memref<8x258xf32, #tpu.memory_space<vmem>>, vector<8x258xf32>
    tpu.vector_store %arg5[%c0_12, %c0_13], %13 {strides = array<i32>} : memref<8x258xf32, #tpu.memory_space<vmem>>, vector<8x258xf32>,
    %c0_14 = arith.constant 0 : index
    %c0_15 = arith.constant 0 : index
    %18 = vector.load %arg6[%c0_14, %c0_15] : memref<8x258xf32, #tpu.memory_space<vmem>>, vector<8x258xf32>
    tpu.vector_store %arg6[%c0_14, %c0_15], %16 {strides = array<i32>} : memref<8x258xf32, #tpu.memory_space<vmem>>, vector<8x258xf32>,
    %c0_16 = arith.constant 0 : index
    %c0_17 = arith.constant 0 : index
    %19 = vector.load %arg7[%c0_16, %c0_17] : memref<8x258xf32, #tpu.memory_space<vmem>>, vector<8x258xf32>
    tpu.vector_store %arg7[%c0_16, %c0_17], %14 {strides = array<i32>} : memref<8x258xf32, #tpu.memory_space<vmem>>, vector<8x258xf32>,
    %c1_i32 = arith.constant 1 : i32
    %20 = vector.broadcast %c1_i32 : i32 to vector<1x256xi32>
    %21 = arith.cmpi sge, %6, %20 : vector<1x256xi32>
    %22 = vector.shape_cast %21 : vector<1x256xi1> to vector<1x256xi1>
    %23 = vector.broadcast %22 : vector<1x256xi1> to vector<8x256xi1>
    %c14_i32 = arith.constant 14 : i32
    %24 = vector.broadcast %c14_i32 : i32 to vector<1x256xi32>
    %25 = arith.cmpi sle, %6, %24 : vector<1x256xi32>
    %26 = vector.shape_cast %25 : vector<1x256xi1> to vector<1x256xi1>
    %27 = vector.broadcast %26 : vector<1x256xi1> to vector<8x256xi1>
    %c0_18 = arith.constant 0 : index
    %c0_19 = arith.constant 0 : index
    %28 = vector.load %arg5[%c0_18, %c0_19] : memref<8x258xf32, #tpu.memory_space<vmem>>, vector<8x256xf32>
    %29 = arith.select %23, %28, %7 : vector<8x256xi1>, vector<8x256xf32>
    %c0_20 = arith.constant 0 : index
    %c0_21 = arith.constant 0 : index
    %30 = vector.load %arg6[%c0_20, %c0_21] : memref<8x258xf32, #tpu.memory_space<vmem>>, vector<8x256xf32>
    %31 = arith.select %23, %30, %7 : vector<8x256xi1>, vector<8x256xf32>
    %c0_22 = arith.constant 0 : index
    %c0_23 = arith.constant 0 : index
    %32 = vector.load %arg7[%c0_22, %c0_23] : memref<8x258xf32, #tpu.memory_space<vmem>>, vector<8x256xf32>
    %33 = arith.select %23, %32, %7 : vector<8x256xi1>, vector<8x256xf32>
    %c0_24 = arith.constant 0 : index
    %c1 = arith.constant 1 : index
    %34 = vector.load %arg5[%c0_24, %c1] : memref<8x258xf32, #tpu.memory_space<vmem>>, vector<8x256xf32>
    %c0_25 = arith.constant 0 : index
    %c1_26 = arith.constant 1 : index
    %35 = vector.load %arg6[%c0_25, %c1_26] : memref<8x258xf32, #tpu.memory_space<vmem>>, vector<8x256xf32>
    %c0_27 = arith.constant 0 : index
    %c1_28 = arith.constant 1 : index
    %36 = vector.load %arg7[%c0_27, %c1_28] : memref<8x258xf32, #tpu.memory_space<vmem>>, vector<8x256xf32>
    %c0_29 = arith.constant 0 : index
    %c2 = arith.constant 2 : index
    %37 = vector.load %arg5[%c0_29, %c2] : memref<8x258xf32, #tpu.memory_space<vmem>>, vector<8x256xf32>
    %38 = arith.select %27, %37, %7 : vector<8x256xi1>, vector<8x256xf32>
    %c0_30 = arith.constant 0 : index
    %c2_31 = arith.constant 2 : index
    %39 = vector.load %arg6[%c0_30, %c2_31] : memref<8x258xf32, #tpu.memory_space<vmem>>, vector<8x256xf32>
    %40 = arith.select %27, %39, %7 : vector<8x256xi1>, vector<8x256xf32>
    %c0_32 = arith.constant 0 : index
    %c2_33 = arith.constant 2 : index
    %41 = vector.load %arg7[%c0_32, %c2_33] : memref<8x258xf32, #tpu.memory_space<vmem>>, vector<8x256xf32>
    %42 = arith.select %27, %41, %7 : vector<8x256xi1>, vector<8x256xf32>
    %43 = arith.maximumf %29, %34 : vector<8x256xf32>
    %44 = arith.maximumf %43, %38 : vector<8x256xf32>
    %45 = arith.minimumf %31, %35 : vector<8x256xf32>
    %46 = arith.maximumf %31, %35 : vector<8x256xf32>
    %47 = arith.minimumf %46, %40 : vector<8x256xf32>
    %48 = arith.maximumf %45, %47 : vector<8x256xf32>
    %49 = arith.minimumf %33, %36 : vector<8x256xf32>
    %50 = arith.minimumf %49, %42 : vector<8x256xf32>
    %51 = arith.minimumf %44, %48 : vector<8x256xf32>
    %52 = arith.maximumf %44, %48 : vector<8x256xf32>
    %53 = arith.minimumf %52, %50 : vector<8x256xf32>
    %54 = arith.maximumf %51, %53 : vector<8x256xf32>
    %c0_34 = arith.constant 0 : index
    %c0_35 = arith.constant 0 : index
    %55 = vector.load %arg3[%c0_34, %c0_35] : memref<8x256xf32, #tpu.memory_space<vmem>>, vector<8x256xf32>
    tpu.vector_store %arg3[%c0_34, %c0_35], %54 {strides = array<i32>} : memref<8x256xf32, #tpu.memory_space<vmem>>, vector<8x256xf32>,
    return
  }
  func.func @transform_0(%arg0: i32) -> (i32, i32) {
    %c0_i32 = arith.constant 0 : i32
    %c0_i32_0 = arith.constant 0 : i32
    %c0_i32_1 = arith.constant 0 : i32
    return %c0_i32, %c0_i32_0 : i32, i32
  }
  func.func @transform_1(%arg0: i32) -> (i32, i32) {
    %c0_i32 = arith.constant 0 : i32
    %c0_i32_0 = arith.constant 0 : i32
    return %arg0, %c0_i32 : i32, i32
  }
  func.func @transform_2(%arg0: i32) -> (i32, i32) {
    %c0_i32 = arith.constant 0 : i32
    %c0_i32_0 = arith.constant 0 : i32
    return %arg0, %c0_i32 : i32, i32
  }
}

</mosaic_0001>

<bundles_post_ra>
// kernel: tpu_custom_call.1
= control target key start
LH: loop header
LB: loop body
LE: loop exit
PB: predicated region body
PF: predicated region fallthrough
CT: control target
= control target key end

     0   :  { %7 = vsyncpa [#allocation7], 0  ;;  %s524_s0 = inlined_call_operand.hbm [shape: s32[1,256], index: 0, kind: input, shape index: {}]   ;;  %s525_s1 = inlined_call_operand.hbm [shape: f32[8,256], index: 1, kind: input, shape index: {}]   ;;  %s526_s2 = inlined_call_operand.hbm [shape: f32[8,256], index: 2, kind: output, shape index: {}]  }
   0x1   :  { %8 = vsyncpa [#allocation10], 0 }
   0x2   :  { %9 = vsyncpa [#allocation8], 0  ;;  %s15_s11 = sshll.u32 %s524_s0, 4  ;;  %s389_s12 = smov [#allocation6]   ;;  %s16_s11 = int_to_ptr.hbm [resolvable:$true] %s15_s11 }
   0x3   :  { %s17_s13 = sshll.u32 %s389_s12, 4  ;;  %s26_s16 = sshll.u32 %s525_s1, 4  ;;  %s18_s13 = int_to_ptr.vmem [resolvable:$true] %s17_s13  ;;  %s27_s16 = int_to_ptr.hbm [resolvable:$true] %s26_s16 }
   0x4   :  { %20 = dma.hbm_to_vmem [thread:$0]  %s16_s11, 32, %s18_s13, [#allocation7]  }
   0x5   :  { %s390_s17 = smov [#allocation9]  }
   0x6   :  { %s28_s18 = sshll.u32 %s390_s17, 4  ;;  %s29_s18 = int_to_ptr.vmem [resolvable:$true] %s28_s18 }
   0x7   :  { %31 = dma.hbm_to_vmem [thread:$0]  %s27_s16, 256, %s29_s18, [#allocation10]  }
   0x8   :  { %383 = dma.done.wait [#allocation7], 32  }
   0x9   :  { %384 = vsyncadd [#allocation7], 4294967264 }
   0xa   :  { %385 = dma.done.wait [#allocation10], 256  }
   0xb   :  { %386 = vsyncadd [#allocation10], 4294967040  ;;  %vm41_vm0 = vcmask 138240   ;;  %v391_v0 = vmov 0.0   ;;  %s392_s0 = smov 112   ;;  %v44_v1 = vld [vmem:[#allocation9 + $0x8] sm:$0xff] }
   0xc   :  { %56 = vrot.lane.b32.xlu0 %v391_v0, %s392_s0  ;;  %42 = vst.msk [vmem:[#allocation2 + $0x18] sm:$0xff] %vm41_vm0, %v391_v0  ;;  %v43_v2 = vld [vmem:[#allocation9] sm:$0xff]  ;;  %60 = vrot.lane.b32.xlu1 %v44_v1, %s392_s0  ;;  %s393_s1 = smov 96   ;;  %vm64_vm1 = vcmask 916480   ;;  %vm83_vm2 = vcmask 785408   ;;  %s394_s19 = smov 17  }
   0xd   :  { %77 = vrot.lane.b32.xlu2 %v43_v2, %s393_s1  ;;  %s395_s20 = smov 127   ;;  %vm117_vm3 = vcmask 15360   ;;  %s396_s21 = smov 126   ;;  %v47_v61 = vld [vmem:[#allocation6] sm:$0x3]  ;;  %v397_v0 = vmov 0  }
   0xe   :  { %vm153_vm4 = vcmp.ge.s32.totalorder %v47_v61, 1  ;;  %vm159_vm5 = vcmp.le.s32.totalorder %v47_v61, 14  ;;  %vm189_vm8 = vcmask 1031168   ;;  %vm232_vm9 = vcmask 1039360   ;;  %s398_s22 = smov [#allocation11]   ;;  %s290_s26 = sshll.u32 %s526_s2, 4  ;;  %s291_s26 = int_to_ptr.hbm [resolvable:$true] %s290_s26 }
   0xf   :  { %s288_s23 = sshll.u32 %s398_s22, 4  ;;  %s289_s23 = int_to_ptr.vmem [resolvable:$true] %s288_s23 }
  0x13   :  { %v51_v3 = vld [vmem:[#allocation2 + $0x18] sm:$0xff] }
  0x14   :  { %58 = vrot.lane.b32.xlu0 %v43_v2, %s392_s0  ;;  %62 = vrot.lane.b32.xlu1 %v51_v3, %s392_s0 }
  0x15   :  { %79 = vrot.lane.b32.xlu2 %v44_v1, %s393_s1 }
  0x1c   :  { %81 = vrot.lane.b32.xlu0 %v51_v3, %s393_s1 }
  0x67   :  { %v78_v4 = vpop.permute.xlu2 %77 }
  0x6f   :  { %v80_v6 = vpop.permute.xlu2 %79 }
  0x70   :  { %v84_v11 = vsel %vm83_vm2, %v78_v4, %v80_v6 }
  0x7e   :  { %v57_v5 = vpop.permute.xlu0 %56  ;;  %v61_v7 = vpop.permute.xlu1 %60 }
  0x86   :  { %v59_v8 = vpop.permute.xlu0 %58  ;;  %v63_v18 = vpop.permute.xlu1 %62 }
  0x87   :  { %v65_v9 = vsel %vm64_vm1, %v57_v5, %v59_v8  ;;  %v66_v10 = vsel %vm64_vm1, %v59_v8, %v61_v7  ;;  %v67_v21 = vsel %vm64_vm1, %v61_v7, %v63_v18  ;;  %v160_v5 = vsel %vm159_vm5, 1, %v397_v0 }
  0x88   :  { %v71_v12 = vmin.f32 %v65_v9, 0.0  ;;  %v72_v13 = vmin.f32 %v43_v2, %v66_v10  ;;  %v74_v14 = vmax.f32 %v65_v9, 0.0  ;;  %v75_v15 = vmax.f32 %v43_v2, %v66_v10 }
  0x89   :  { %v73_v23 = vmin.f32 %v44_v1, %v67_v21  ;;  %v76_v25 = vmax.f32 %v44_v1, %v67_v21  ;;  %v154_v1 = vsel %vm153_vm4, 1, %v397_v0  ;;  %v162_v9 = vperm.slane %v160_v5, 1 }
  0x8a   :  { %v90_v16 = vmin.f32 %v72_v13, %v84_v11  ;;  %v89_v17 = vmin.f32 %v71_v12, %v78_v4  ;;  %v95_v19 = vmin.f32 %v74_v14, %v78_v4  ;;  %v96_v20 = vmin.f32 %v75_v15, %v84_v11 }
  0x8b   :  { %v93_v31 = vmax.f32 %v75_v15, %v84_v11  ;;  %v92_v32 = vmax.f32 %v74_v14, %v78_v4  ;;  %v155_v3 = vperm.slane %v154_v1, 0  ;;  %v156_v4 = vperm.slane %v154_v1, 1 }
  0x8c   :  { %106 = vrot.lane.b32.xlu2 %v90_v16, %s394_s19  ;;  %104 = vrot.lane.b32.xlu1 %v89_v17, %s394_s19  ;;  %v99_v27 = vmax.f32 %v72_v13, %v96_v20  ;;  %v98_v28 = vmax.f32 %v71_v12, %v95_v19  ;;  %v161_v10 = vperm.slane %v160_v5, 0  ;;  %vm487_vm10 = vcmp.eq.s32.totalorder %v162_v9, 1 }
  0x8d   :  { %vm464_vm6 = vcmp.eq.s32.totalorder %v155_v3, 1  ;;  %vm468_vm7 = vcmp.eq.s32.totalorder %v156_v4, 1 }
  0x8e   :  { %v82_v22 = vpop.permute.xlu0 %81  ;;  %vm492_vm11 = vcmp.eq.s32.totalorder %v161_v10, 1 }
  0x8f   :  { %v85_v24 = vsel %vm83_vm2, %v80_v6, %v82_v22 }
  0x90   :  { %v91_v26 = vmin.f32 %v73_v23, %v85_v24  ;;  %v97_v29 = vmin.f32 %v76_v25, %v85_v24  ;;  %v94_v33 = vmax.f32 %v76_v25, %v85_v24 }
  0x92   :  { %108 = vrot.lane.b32.xlu0 %v91_v26, %s394_s19  ;;  %v100_v30 = vmax.f32 %v73_v23, %v97_v29 }
  0x94   :  { %124 = vrot.lane.b32.xlu2 %v99_v27, %s394_s19  ;;  %122 = vrot.lane.b32.xlu1 %v98_v28, %s394_s19 }
  0x9a   :  { %126 = vrot.lane.b32.xlu0 %v100_v30, %s394_s19 }
  0x9c   :  { %141 = vrot.lane.b32.xlu2 %v93_v31, %s394_s19  ;;  %139 = vrot.lane.b32.xlu1 %v92_v32, %s394_s19 }
  0xa2   :  { %143 = vrot.lane.b32.xlu0 %v94_v33, %s394_s19 }
  0xe6   :  { %v107_v34 = vpop.permute.xlu2 %106 }
  0xee   :  { %v125_v37 = vpop.permute.xlu2 %124 }
  0xf6   :  { %v142_v44 = vpop.permute.xlu2 %141 }
  0xfe   :  { %v105_v35 = vpop.permute.xlu1 %104 }
  0xff   :  { %v427_v36 = vsel %vm41_vm0, %v105_v35, %v107_v34 }
 0x100   :  { %226 = vrot.lane.b32.xlu2 %v427_v36, %s395_s20  ;;  %v167_v12 = vsel %vm464_vm6, %v427_v36, 0.0 }
 0x104   :  { %v109_v38 = vpop.permute.xlu0 %108 }
 0x105   :  { %v432_v39 = vsel %vm41_vm0, %v107_v34, %v109_v38  ;;  %118 = vst.msk [vmem:[#allocation3 + $0x10] sm:$0xff] %vm117_vm3, %v109_v38 }
 0x106   :  { %v123_v40 = vpop.permute.xlu1 %122  ;;  %v168_v16 = vsel %vm468_vm7, %v432_v39, 0.0 }
 0x107   :  { %v436_v41 = vsel %vm41_vm0, %v123_v40, %v125_v37 }
 0x108   :  { %185 = vrot.lane.b32.xlu2 %v432_v39, %s396_s21  ;;  %v171_v17 = vsel %vm464_vm6, %v436_v41, 0.0 }
 0x10c   :  { %v127_v42 = vpop.permute.xlu0 %126  ;;  %v177_v43 = vld [vmem:[#allocation3 + $0x10] sm:$0xff] }
 0x10d   :  { %v129_v45 = vsel %vm41_vm0, %v125_v37, %v127_v42  ;;  %135 = vst.msk [vmem:[#allocation4 + $0x10] sm:$0xff] %vm117_vm3, %v127_v42  ;;  %187 = vrot.lane.b32.xlu0 %v177_v43, %s396_s21  ;;  %230 = vrot.lane.b32.xlu1 %v177_v43, %s395_s20 }
 0x10e   :  { %v140_v46 = vpop.permute.xlu1 %139  ;;  %v172_v18 = vsel %vm468_vm7, %v129_v45, 0.0 }
 0x10f   :  { %v443_v47 = vsel %vm41_vm0, %v140_v46, %v142_v44 }
 0x110   :  { %v175_v35 = vsel %vm464_vm6, %v443_v47, 0.0 }
 0x114   :  { %v144_v48 = vpop.permute.xlu0 %143  ;;  %v178_v51 = vld [vmem:[#allocation4 + $0x10] sm:$0xff] }
 0x115   :  { %v446_v49 = vsel %vm41_vm0, %v142_v44, %v144_v48  ;;  %152 = vst.msk [vmem:[#allocation5 + $0x10] sm:$0xff] %vm117_vm3, %v144_v48  ;;  %183 = vrot.lane.b32.xlu1 %v427_v36, %s396_s21 }
 0x116   :  { %261 = vrot.lane.b32.xlu2 %v446_v49, %s395_s20 }
 0x11c   :  { %v179_v50 = vld [vmem:[#allocation5 + $0x10] sm:$0xff] }
 0x11d   :  { %259 = vrot.lane.b32.xlu1 %v443_v47, %s395_s20  ;;  %263 = vrot.lane.b32.xlu0 %v179_v50, %s395_s20 }
 0x11e   :  { %241 = vrot.lane.b32.xlu2 %v436_v41, %s395_s20 }
 0x125   :  { %245 = vrot.lane.b32.xlu1 %v178_v51, %s395_s20  ;;  %228 = vrot.lane.b32.xlu0 %v432_v39, %s395_s20 }
 0x126   :  { %199 = vrot.lane.b32.xlu2 %v436_v41, %s396_s21 }
 0x12d   :  { %203 = vrot.lane.b32.xlu1 %v178_v51, %s396_s21  ;;  %243 = vrot.lane.b32.xlu0 %v129_v45, %s395_s20 }
 0x12e   :  { %216 = vrot.lane.b32.xlu2 %v446_v49, %s396_s21 }
 0x135   :  { %214 = vrot.lane.b32.xlu1 %v443_v47, %s396_s21  ;;  %201 = vrot.lane.b32.xlu0 %v129_v45, %s396_s21 }
 0x13d   :  { %218 = vrot.lane.b32.xlu0 %v179_v50, %s396_s21 }
 0x15a   :  { %v227_v52 = vpop.permute.xlu2 %226 }
 0x162   :  { %v186_v54 = vpop.permute.xlu2 %185 }
 0x170   :  { %v262_v57 = vpop.permute.xlu2 %261 }
 0x178   :  { %v242_v60 = vpop.permute.xlu2 %241 }
 0x17f   :  { %v231_v53 = vpop.permute.xlu1 %230  ;;  %v188_v55 = vpop.permute.xlu0 %187 }
 0x180   :  { %v200_v2 = vpop.permute.xlu2 %199  ;;  %v191_v21 = vsel %vm189_vm8, %v186_v54, %v188_v55 }
 0x181   :  { %v195_v43 = vsel %vm487_vm10, %v191_v21, 0.0 }
 0x187   :  { %v184_v56 = vpop.permute.xlu1 %183 }
 0x188   :  { %v190_v23 = vsel %vm189_vm8, %v184_v56, %v186_v54  ;;  %v217_v24 = vpop.permute.xlu2 %216 }
 0x189   :  { %v194_v44 = vsel %vm492_vm11, %v190_v23, 0.0 }
 0x18f   :  { %v260_v58 = vpop.permute.xlu1 %259  ;;  %v264_v59 = vpop.permute.xlu0 %263 }
 0x190   :  { %v265_v25 = vsel %vm232_vm9, %v260_v58, %v262_v57  ;;  %v266_v51 = vsel %vm232_vm9, %v262_v57, %v264_v59  ;;  %v176_v58 = vsel %vm468_vm7, %v446_v49, 0.0 }
 0x191   :  { %v269_v45 = vmin.f32 %v175_v35, %v265_v25  ;;  %v270_v61 = vmin.f32 %v176_v58, %v266_v51 }
 0x197   :  { %v246_v62 = vpop.permute.xlu1 %245  ;;  %v229_v63 = vpop.permute.xlu0 %228 }
 0x198   :  { %v233_v13 = vsel %vm232_vm9, %v227_v52, %v229_v63  ;;  %v234_v14 = vsel %vm232_vm9, %v229_v63, %v231_v53 }
 0x199   :  { %v237_v26 = vmax.f32 %v167_v12, %v233_v13  ;;  %v238_v27 = vmax.f32 %v168_v16, %v234_v14 }
 0x19b   :  { %v239_v46 = vmax.f32 %v237_v26, %v194_v44  ;;  %v240_v47 = vmax.f32 %v238_v27, %v195_v43 }
 0x19f   :  { %v204_v6 = vpop.permute.xlu1 %203  ;;  %v244_v7 = vpop.permute.xlu0 %243 }
 0x1a0   :  { %v247_v15 = vsel %vm232_vm9, %v242_v60, %v244_v7  ;;  %v248_v19 = vsel %vm232_vm9, %v244_v7, %v246_v62 }
 0x1a1   :  { %v253_v28 = vmax.f32 %v171_v17, %v247_v15  ;;  %v254_v31 = vmax.f32 %v172_v18, %v248_v19  ;;  %v251_v36 = vmin.f32 %v171_v17, %v247_v15  ;;  %v252_v39 = vmin.f32 %v172_v18, %v248_v19 }
 0x1a7   :  { %v215_v29 = vpop.permute.xlu1 %214  ;;  %v202_v30 = vpop.permute.xlu0 %201 }
 0x1a8   :  { %v220_v32 = vsel %vm189_vm8, %v215_v29, %v217_v24  ;;  %v205_v33 = vsel %vm189_vm8, %v200_v2, %v202_v30  ;;  %v206_v34 = vsel %vm189_vm8, %v202_v30, %v204_v6 }
 0x1a9   :  { %v209_v37 = vsel %vm492_vm11, %v205_v33, 0.0  ;;  %v210_v38 = vsel %vm487_vm10, %v206_v34, 0.0  ;;  %v224_v40 = vsel %vm492_vm11, %v220_v32, 0.0 }
 0x1aa   :  { %v255_v41 = vmin.f32 %v253_v28, %v209_v37  ;;  %v256_v42 = vmin.f32 %v254_v31, %v210_v38  ;;  %v271_v52 = vmin.f32 %v269_v45, %v224_v40 }
 0x1ac   :  { %v257_v48 = vmax.f32 %v251_v36, %v255_v41  ;;  %v258_v50 = vmax.f32 %v252_v39, %v256_v42 }
 0x1ae   :  { %v273_v53 = vmin.f32 %v239_v46, %v257_v48  ;;  %v274_v54 = vmin.f32 %v240_v47, %v258_v50  ;;  %v275_v55 = vmax.f32 %v239_v46, %v257_v48  ;;  %v276_v56 = vmax.f32 %v240_v47, %v258_v50 }
 0x1af   :  { %v219_v60 = vpop.permute.xlu0 %218 }
 0x1b0   :  { %v221_v62 = vsel %vm189_vm8, %v217_v24, %v219_v60  ;;  %v277_v63 = vmin.f32 %v275_v55, %v271_v52 }
 0x1b1   :  { %v225_v0 = vsel %vm487_vm10, %v221_v62, 0.0 }
 0x1b2   :  { %v272_v1 = vmin.f32 %v270_v61, %v225_v0  ;;  %v279_v2 = vmax.f32 %v273_v53, %v277_v63 }
 0x1b4   :  { %v278_v57 = vmin.f32 %v276_v56, %v272_v1  ;;  %281 = vst [vmem:[#allocation11] sm:$0xff] %v279_v2 }
 0x1b6   :  { %v280_v59 = vmax.f32 %v274_v54, %v278_v57 }
 0x1b8   :  { %282 = vst [vmem:[#allocation11 + $0x8] sm:$0xff] %v280_v59 }
 0x1b9   :  { %293 = dma.vmem_to_hbm [thread:$0]  %s289_s23, 256, %s291_s26, [#allocation8]  }
 0x1ba   :  { %387 = dma.done.wait [#allocation8], 256  }
 0x1bb   :  { %388 = vsyncadd [#allocation8], 4294967040 }
 0x1bc   :  { %298 = vsyncpa [#allocation7], 1 }
 0x1bd   :  { %299 = vsyncpa [#allocation10], 1 }
 0x1be   :  { %300 = vsyncpa [#allocation8], 1 }

</bundles_post_ra>
